<compile_context>
chip_gen: v7x
topology: tpu7x:2x2x1
jax: 0.10.0
libtpu: 0.0.40
codegen_flags: <defaults>
</compile_context>

<pallas_src>
import functools

import jax
import jax.numpy as jnp
from jax import lax
from jax.experimental import pallas as pl
from jax.experimental.pallas import tpu as pltpu


def _dsconv_kernel(x_ref, dww_ref, b1_ref, pww_ref, b2_ref, o_ref,
                   halo_ref, y_ref, *, strip):
    """One (batch, H-tile) step of the fused depthwise-separable block.

    x_ref   : [H, W, C]      unpadded input image for this batch element (VMEM resident)
    dww_ref : [3, 3, C]      depthwise 3x3 weights with BN1 scale folded in (f32)
    b1_ref  : [1, C]         BN1 bias (f32)
    pww_ref : [C, Cout]      pointwise weights with BN2 scale folded in (mxu dtype)
    b2_ref  : [1, Cout]      BN2 bias (f32)
    o_ref   : [TH, W, Cout]  output tile (rows i*TH .. i*TH+TH-1)
    halo_ref: [TH+2, W, C]   scratch: row-halo'd input tile (zero rows at the image edges)
    y_ref   : [TH, W, C]     scratch: depthwise + BN1-bias + ReLU output (mxu dtype)
    """
    TH, W, Coutp = o_ref.shape
    Cp = x_ref.shape[-1]
    i = pl.program_id(1)
    n_h = pl.num_programs(1)
    row0 = pl.multiple_of(i * TH, TH)

    # ---- build the row-halo'd tile in VMEM (the 'same' zero padding never touches HBM) ---
    zero_row = jnp.zeros((W, Cp), dtype=halo_ref.dtype)
    halo_ref[0] = zero_row                                 # top halo row (overwritten below
    halo_ref[TH + 1] = zero_row                            # if inside the image)
    halo_ref[pl.ds(1, TH)] = x_ref[pl.ds(row0, TH)]        # core rows, always valid

    @pl.when(i > 0)
    def _():
        halo_ref[0] = x_ref[row0 - 1]

    @pl.when(i < n_h - 1)
    def _():
        halo_ref[TH + 1] = x_ref[row0 + TH]

    dw = dww_ref[...].astype(jnp.float32)                  # (3, 3, Cp), BN1 scale folded
    b1 = b1_ref[...]                                       # (1, Cp)
    zcol = jnp.zeros((strip + 2, 1, Cp), jnp.float32)      # hoisted out of the strip loop

    # ---- depthwise 3x3 (stride 1, 'same') as 9 shifted FMAs per 8-row strip --------------
    # The strip accumulator stays in vregs; each strip is stored to y_ref exactly once.
    # TODO(synk): the +/-1 column shifts could use pltpu.roll (XLU) + an iota mask instead
    #             of the zero-column concatenation to free load/store slots further.
    for s in range(TH // strip):
        r = s * strip
        xs = halo_ref[pl.ds(r, strip + 2)].astype(jnp.float32)      # cast hoisted, once
        x_cols = (
            jnp.concatenate([zcol, xs[:, :W - 1, :]], axis=1),      # kw=0: input col j-1
            xs,                                                     # kw=1: input col j
            jnp.concatenate([xs[:, 1:, :], zcol], axis=1),          # kw=2: input col j+1
        )
        acc = None
        for kh in range(3):
            for kw in range(3):
                t = x_cols[kw][kh:kh + strip] * dw[kh, kw]          # row shift is free
                acc = t if acc is None else acc + t                 # init from first tap
        # BN1 bias + ReLU (scale already folded into dw); SE is Identity (se_ratio = 0.0).
        y_ref[pl.ds(r, strip)] = jnp.maximum(acc + b1, 0.0).astype(y_ref.dtype)

    # ---- pointwise 1x1 conv == channel matmul on the MXU (f32 accumulation) --------------
    # TODO(synk): for W not a multiple of 8 (7x7/14x14 stages) this reshape copies; pad W
    #             or flatten the whole plane per grid step in that regime.
    y2 = lax.dot_general(
        y_ref[...].reshape(TH * W, Cp), pww_ref[...],
        (((1,), (0,)), ((), ())),
        preferred_element_type=jnp.float32,
    ).reshape(TH, W, Coutp)

    # ---- BN2 bias (scale folded into pw weights); act2 is Identity (pw_act=False) --------
    y2 = y2 + b2_ref[...]

    # ---- residual add (stride==1, in_chs==out_chs, drop_path_rate==0.0) ------------------
    shortcut = halo_ref[pl.ds(1, TH)].astype(jnp.float32)
    o_ref[...] = (y2 + shortcut).astype(o_ref.dtype)


def depthwise_separable_conv(x_nchw, dw_w, s1, b1, pw_w, s2, b2, *,
                             tile_h=None, mxu_dtype=jnp.bfloat16,
                             input_dtype=None, lane_multiple=None):
    """x_nchw: [N, C, H, W] (PyTorch layout).  Returns [N, C_out, H, W], dtype of x.

    mxu_dtype    : operand dtype for the pointwise MXU matmul (bf16 fast / f32 exact).
    input_dtype  : optional dtype for the VMEM-resident activations (e.g. bf16).
    lane_multiple: if set (e.g. 128), channels are zero-padded to that multiple so all
                   lane-axis operands and output stores are dense.
    """
    N, C, H, W = x_nchw.shape
    kh, kw, cdw = dw_w.shape
    Cout = pw_w.shape[1]
    # Guard the configuration this kernel implements (module defaults).
    assert (kh, kw) == (3, 3) and cdw == C, "depthwise kernel must be 3x3 per-channel"
    assert pw_w.shape[0] == C
    assert C == Cout, "residual path (has_residual) requires in_chs == out_chs and stride 1"
    # TODO(synk): stride>1 / dilation>1 / non-3x3 depthwise variants are not implemented.

    # ---- fold BN scales into the conv weights (one-time wrapper cost) --------------------
    dw_wf = dw_w.astype(jnp.float32) * s1.astype(jnp.float32)[None, None, :]
    pw_wf = pw_w.astype(jnp.float32) * s2.astype(jnp.float32)[None, :]
    b1f = b1.astype(jnp.float32)
    b2f = b2.astype(jnp.float32)

    # ---- optional channel (lane) padding so stores / MXU lanes are dense ------------------
    Cp, Coutp = C, Cout
    if lane_multiple:
        Cp = -(-C // lane_multiple) * lane_multiple
        Coutp = -(-Cout // lane_multiple) * lane_multiple
        dw_wf = jnp.pad(dw_wf, ((0, 0), (0, 0), (0, Cp - C)))
        b1f = jnp.pad(b1f, ((0, Cp - C),))
        pw_wf = jnp.pad(pw_wf, ((0, Cp - C), (0, Coutp - Cout)))
        b2f = jnp.pad(b2f, ((0, Coutp - Cout),))
    pw_wf = pw_wf.astype(mxu_dtype)                # pre-cast once; kernel uses it as-is

    # ---- NCHW -> NHWC (channels on the lane axis); NO spatial zero-padding in HBM --------
    # TODO(synk): if the surrounding model stays NHWC these two transposes disappear too.
    x = jnp.transpose(x_nchw, (0, 2, 3, 1))                      # [N, H, W, C]
    if input_dtype is not None:
        x = x.astype(input_dtype)
    if Cp != C:
        x = jnp.pad(x, ((0, 0), (0, 0), (0, 0), (0, Cp - C)))

    # ---- H-tile selection: largest divisor of H within an ~8 MiB working set, prefer x8 --
    # TODO(synk): switch to pl.cdiv tiling with a masked last tile for H without nice divisors.
    if tile_h is None:
        budget = 8 * 1024 * 1024
        per_row = W * max(Cp, Coutp) * 4 * 6
        max_th = max(1, budget // per_row)
        divs = [d for d in range(1, H + 1) if H % d == 0 and d <= max_th]
        mult8 = [d for d in divs if d % 8 == 0]
        tile_h = max(mult8) if mult8 else max(divs)
    assert H % tile_h == 0, "tile_h must divide H"
    n_h = H // tile_h
    strip = 8 if tile_h % 8 == 0 else tile_h

    # ---- shape-derived VMEM limit (double-buffered resident image + tiles + scratch) -----
    in_it = jnp.dtype(x.dtype).itemsize
    out_it = jnp.dtype(x_nchw.dtype).itemsize
    mxu_it = jnp.dtype(mxu_dtype).itemsize
    est = (2 * H * W * Cp * in_it                      # resident image (double-buffered)
           + 2 * tile_h * W * Coutp * out_it           # output tiles (double-buffered)
           + (tile_h + 2) * W * Cp * in_it             # halo scratch
           + tile_h * W * Cp * mxu_it                  # depthwise-output scratch
           + Cp * Coutp * mxu_it + 32 * Cp * 4)        # weights / biases
    vmem_limit = int(min(64 * 1024 * 1024, max(32 * 1024 * 1024, 2 * est)))

    flops = N * H * W * (18 * Cp + 2 * Cp * Coutp + 4 * Coutp)
    bytes_accessed = (x.size * in_it + N * H * W * Coutp * out_it
                      + (dw_wf.size + b1f.size + b2f.size) * 4 + pw_wf.size * mxu_it)

    out = pl.pallas_call(
        functools.partial(_dsconv_kernel, strip=strip),
        out_shape=jax.ShapeDtypeStruct((N, H, W, Coutp), x_nchw.dtype),
        grid=(N, n_h),
        in_specs=[
            # Unpadded image: block index is independent of the H-tile axis, so it stays
            # VMEM-resident across the inner grid axis (fetched from HBM once per batch elem).
            pl.BlockSpec((None, H, W, Cp), lambda n, i: (n, 0, 0, 0)),
            pl.BlockSpec((3, 3, Cp), lambda n, i: (0, 0, 0)),
            pl.BlockSpec((1, Cp), lambda n, i: (0, 0)),
            pl.BlockSpec((Cp, Coutp), lambda n, i: (0, 0)),
            pl.BlockSpec((1, Coutp), lambda n, i: (0, 0)),
        ],
        out_specs=pl.BlockSpec((None, tile_h, W, Coutp), lambda n, i: (n, i, 0, 0)),
        scratch_shapes=[
            pltpu.VMEM((tile_h + 2, W, Cp), x.dtype),     # row-halo'd input tile
            pltpu.VMEM((tile_h, W, Cp), mxu_dtype),       # depthwise+ReLU output
        ],
        compiler_params=pltpu.CompilerParams(
            dimension_semantics=("parallel", "parallel"),
            vmem_limit_bytes=vmem_limit,
        ),
        cost_estimate=pl.CostEstimate(
            flops=int(flops), transcendentals=0, bytes_accessed=int(bytes_accessed)),
    )(x, dw_wf, b1f.reshape(1, Cp), pw_wf, b2f.reshape(1, Coutp))

    if Coutp != Cout:
        out = out[..., :Cout]
    return jnp.transpose(out, (0, 3, 1, 2))                      # back to NCHW


def _reference(x_nchw, dw_w, s1, b1, pw_w, s2, b2):
    """Plain-JAX f32 reference using lax.conv_general_dilated (for validation)."""
    N, C, H, W = x_nchw.shape
    Cout = pw_w.shape[1]
    x = jnp.transpose(x_nchw, (0, 2, 3, 1)).astype(jnp.float32)
    dn = ("NHWC", "HWIO", "NHWC")
    y = lax.conv_general_dilated(
        x, dw_w.reshape(3, 3, 1, C), (1, 1), "SAME",
        feature_group_count=C, dimension_numbers=dn)
    y = jnp.maximum(y * s1 + b1, 0.0)
    y = lax.conv_general_dilated(
        y, pw_w.reshape(1, 1, C, Cout), (1, 1), "SAME", dimension_numbers=dn)
    y = y * s2 + b2
    y = y + x
    return jnp.transpose(y, (0, 3, 1, 2))


if __name__ == "__main__":
    key = jax.random.PRNGKey(0)
    N, C, H, W = 2, 4, 16, 16          # in_chs == out_chs -> residual path active
    Cout = C

    ks = jax.random.split(key, 8)
    x = jax.random.normal(ks[0], (N, C, H, W), jnp.float32)

    # Parameters (deterministic synthetic init; shapes match the PyTorch module).
    dw_w = jax.random.normal(ks[1], (3, 3, C), jnp.float32) * 0.2   # conv_dw.weight [C,1,3,3] -> [3,3,C]
    pw_w = jax.random.normal(ks[2], (C, Cout), jnp.float32) * 0.2   # conv_pw.weight [Cout,C,1,1] -> [C,Cout]

    # BatchNorm (eval mode) folded to per-channel scale/bias.
    eps = 1e-5
    g1 = 1.0 + 0.1 * jax.random.normal(ks[3], (C,), jnp.float32)
    be1 = 0.1 * jax.random.normal(ks[4], (C,), jnp.float32)
    rm1 = jnp.zeros((C,), jnp.float32)
    rv1 = jnp.ones((C,), jnp.float32)
    s1 = g1 / jnp.sqrt(rv1 + eps)
    b1 = be1 - rm1 * s1

    g2 = 1.0 + 0.1 * jax.random.normal(ks[5], (Cout,), jnp.float32)
    be2 = 0.1 * jax.random.normal(ks[6], (Cout,), jnp.float32)
    rm2 = jnp.zeros((Cout,), jnp.float32)
    rv2 = jnp.ones((Cout,), jnp.float32)
    s2 = g2 / jnp.sqrt(rv2 + eps)
    b2 = be2 - rm2 * s2

    ref = _reference(x, dw_w, s1, b1, pw_w, s2, b2)

    # 1) f32-MXU mode, tile_h=8 -> grid (2, 2): exercises the in-kernel halo (both edges
    #    and interior tiles) and the strip loop, with a tight numerical check.
    out_exact = depthwise_separable_conv(x, dw_w, s1, b1, pw_w, s2, b2,
                                         tile_h=8, mxu_dtype=jnp.float32)
    out_exact = jax.block_until_ready(out_exact)
    assert out_exact.shape == (N, Cout, H, W)
    assert jnp.allclose(out_exact, ref, atol=1e-4, rtol=1e-4), \
        float(jnp.max(jnp.abs(out_exact - ref)))

    # 2) Default fast path: bf16 MXU operands with f32 accumulation, auto tile_h.
    out_fast = depthwise_separable_conv(x, dw_w, s1, b1, pw_w, s2, b2)
    out_fast = jax.block_until_ready(out_fast)
    assert out_fast.shape == (N, Cout, H, W)
    assert jnp.allclose(out_fast, ref, atol=5e-2, rtol=5e-2), \
        float(jnp.max(jnp.abs(out_fast - ref)))

    # 3) Lane-dense path: channels zero-padded to 128 and bf16 resident activations.
    out_pad = depthwise_separable_conv(x, dw_w, s1, b1, pw_w, s2, b2,
                                       lane_multiple=128, input_dtype=jnp.bfloat16)
    out_pad = jax.block_until_ready(out_pad)
    assert out_pad.shape == (N, Cout, H, W)
    assert jnp.allclose(out_pad, ref, atol=1e-1, rtol=5e-2), \
        float(jnp.max(jnp.abs(out_pad - ref)))

    # TODO(synk): drop_path (stochastic depth) is a no-op at drop_path_rate=0.0 and the SE
    #             block is Identity at se_ratio=0.0; neither is implemented.
    print("KERNEL_OK")
</pallas_src>

<mosaic_0001>
module attributes {stable_mosaic.version = 11 : i64} {
  func.func @_dsconv_kernel(%arg0: i32, %arg1: i32, %arg2: memref<1x16x16x4xf32, #tpu.memory_space<vmem>>, %arg3: memref<3x3x4xf32, #tpu.memory_space<vmem>>, %arg4: memref<1x4xf32, #tpu.memory_space<vmem>>, %arg5: memref<4x4xf32, #tpu.memory_space<vmem>>, %arg6: memref<1x4xf32, #tpu.memory_space<vmem>>, %arg7: memref<1x8x16x4xf32, #tpu.memory_space<vmem>>, %arg8: memref<10x16x4xf32, #tpu.memory_space<vmem>>, %arg9: memref<8x16x4xf32, #tpu.memory_space<vmem>>) attributes {dimension_semantics = [#tpu.dimension_semantics<parallel>, #tpu.dimension_semantics<parallel>], iteration_bounds = array<i64: 2, 2>, scalar_prefetch = 0 : i64, scratch_operands = 2 : i64, tpu.core_type = #tpu.core_type<tc>, window_params = [{transform_indices = @transform_0, window_bounds = array<i64: 1, 16, 16, 4>}, {pipeline_mode = #tpu.pipeline_mode<synchronous>, transform_indices = @transform_1, window_bounds = array<i64: 3, 3, 4>}, {pipeline_mode = #tpu.pipeline_mode<synchronous>, transform_indices = @transform_2, window_bounds = array<i64: 1, 4>}, {pipeline_mode = #tpu.pipeline_mode<synchronous>, transform_indices = @transform_3, window_bounds = array<i64: 4, 4>}, {pipeline_mode = #tpu.pipeline_mode<synchronous>, transform_indices = @transform_4, window_bounds = array<i64: 1, 4>}, {transform_indices = @transform_5, window_bounds = array<i64: 1, 8, 16, 4>}]} {
    %c8_i32 = arith.constant 8 : i32
    %0 = arith.muli %arg1, %c8_i32 : i32
    %1 = tpu.assume_multiple %0, 8 : i32
    %cst = arith.constant 0.000000e+00 : f32
    %2 = vector.broadcast %cst : f32 to vector<16x4xf32>
    %c0 = arith.constant 0 : index
    %c0_0 = arith.constant 0 : index
    %c0_1 = arith.constant 0 : index
    %3 = vector.load %arg8[%c0, %c0_0, %c0_1] : memref<10x16x4xf32, #tpu.memory_space<vmem>>, vector<1x16x4xf32>
    %4 = vector.shape_cast %3 : vector<1x16x4xf32> to vector<16x4xf32>
    %5 = vector.shape_cast %2 : vector<16x4xf32> to vector<1x16x4xf32>
    tpu.vector_store %arg8[%c0, %c0_0, %c0_1], %5 {strides = array<i32>} : memref<10x16x4xf32, #tpu.memory_space<vmem>>, vector<1x16x4xf32>,
    %c9 = arith.constant 9 : index
    %c0_2 = arith.constant 0 : index
    %c0_3 = arith.constant 0 : index
    %6 = vector.load %arg8[%c9, %c0_2, %c0_3] : memref<10x16x4xf32, #tpu.memory_space<vmem>>, vector<1x16x4xf32>
    %7 = vector.shape_cast %6 : vector<1x16x4xf32> to vector<16x4xf32>
    %8 = vector.shape_cast %2 : vector<16x4xf32> to vector<1x16x4xf32>
    tpu.vector_store %arg8[%c9, %c0_2, %c0_3], %8 {strides = array<i32>} : memref<10x16x4xf32, #tpu.memory_space<vmem>>, vector<1x16x4xf32>,
    %c0_4 = arith.constant 0 : index
    %9 = arith.index_cast %1 : i32 to index
    %c0_5 = arith.constant 0 : index
    %c0_6 = arith.constant 0 : index
    %10 = vector.load %arg2[%c0_4, %9, %c0_5, %c0_6] : memref<1x16x16x4xf32, #tpu.memory_space<vmem>>, vector<1x8x16x4xf32>
    %11 = vector.shape_cast %10 : vector<1x8x16x4xf32> to vector<8x16x4xf32>
    %c1 = arith.constant 1 : index
    %c0_7 = arith.constant 0 : index
    %c0_8 = arith.constant 0 : index
    %12 = vector.load %arg8[%c1, %c0_7, %c0_8] : memref<10x16x4xf32, #tpu.memory_space<vmem>>, vector<8x16x4xf32>
    tpu.vector_store %arg8[%c1, %c0_7, %c0_8], %11 {strides = array<i32>} : memref<10x16x4xf32, #tpu.memory_space<vmem>>, vector<8x16x4xf32>,
    %c0_i32 = arith.constant 0 : i32
    %13 = arith.cmpi sgt, %arg1, %c0_i32 : i32
    %14 = arith.extui %13 : i1 to i32
    %c0_i32_9 = arith.constant 0 : i32
    %15 = arith.cmpi ne, %14, %c0_i32_9 : i32
    scf.if %15 {
      %c1_i32_39 = arith.constant 1 : i32
      %109 = arith.subi %1, %c1_i32_39 : i32
      %c0_40 = arith.constant 0 : index
      %110 = arith.index_cast %109 : i32 to index
      %c0_41 = arith.constant 0 : index
      %c0_42 = arith.constant 0 : index
      %111 = vector.load %arg2[%c0_40, %110, %c0_41, %c0_42] : memref<1x16x16x4xf32, #tpu.memory_space<vmem>>, vector<1x1x16x4xf32>
      %112 = vector.shape_cast %111 : vector<1x1x16x4xf32> to vector<16x4xf32>
      %c0_43 = arith.constant 0 : index
      %c0_44 = arith.constant 0 : index
      %c0_45 = arith.constant 0 : index
      %113 = vector.load %arg8[%c0_43, %c0_44, %c0_45] : memref<10x16x4xf32, #tpu.memory_space<vmem>>, vector<1x16x4xf32>
      %114 = vector.shape_cast %113 : vector<1x16x4xf32> to vector<16x4xf32>
      %115 = vector.shape_cast %112 : vector<16x4xf32> to vector<1x16x4xf32>
      tpu.vector_store %arg8[%c0_43, %c0_44, %c0_45], %115 {strides = array<i32>} : memref<10x16x4xf32, #tpu.memory_space<vmem>>, vector<1x16x4xf32>,
    } else {
    }
    %c1_i32 = arith.constant 1 : i32
    %16 = arith.cmpi slt, %arg1, %c1_i32 : i32
    %17 = arith.extui %16 : i1 to i32
    %c0_i32_10 = arith.constant 0 : i32
    %18 = arith.cmpi ne, %17, %c0_i32_10 : i32
    scf.if %18 {
      %c8_i32_39 = arith.constant 8 : i32
      %109 = arith.addi %1, %c8_i32_39 : i32
      %c0_40 = arith.constant 0 : index
      %110 = arith.index_cast %109 : i32 to index
      %c0_41 = arith.constant 0 : index
      %c0_42 = arith.constant 0 : index
      %111 = vector.load %arg2[%c0_40, %110, %c0_41, %c0_42] : memref<1x16x16x4xf32, #tpu.memory_space<vmem>>, vector<1x1x16x4xf32>
      %112 = vector.shape_cast %111 : vector<1x1x16x4xf32> to vector<16x4xf32>
      %c9_43 = arith.constant 9 : index
      %c0_44 = arith.constant 0 : index
      %c0_45 = arith.constant 0 : index
      %113 = vector.load %arg8[%c9_43, %c0_44, %c0_45] : memref<10x16x4xf32, #tpu.memory_space<vmem>>, vector<1x16x4xf32>
      %114 = vector.shape_cast %113 : vector<1x16x4xf32> to vector<16x4xf32>
      %115 = vector.shape_cast %112 : vector<16x4xf32> to vector<1x16x4xf32>
      tpu.vector_store %arg8[%c9_43, %c0_44, %c0_45], %115 {strides = array<i32>} : memref<10x16x4xf32, #tpu.memory_space<vmem>>, vector<1x16x4xf32>,
    } else {
    }
    %c0_11 = arith.constant 0 : index
    %c0_12 = arith.constant 0 : index
    %c0_13 = arith.constant 0 : index
    %19 = vector.load %arg3[%c0_11, %c0_12, %c0_13] : memref<3x3x4xf32, #tpu.memory_space<vmem>>, vector<3x3x4xf32>
    %c0_14 = arith.constant 0 : index
    %c0_15 = arith.constant 0 : index
    %20 = vector.load %arg4[%c0_14, %c0_15] : memref<1x4xf32, #tpu.memory_space<vmem>>, vector<1x4xf32>
    %cst_16 = arith.constant 0.000000e+00 : f32
    %21 = vector.broadcast %cst_16 : f32 to vector<10x1x4xf32>
    %c0_17 = arith.constant 0 : index
    %c0_18 = arith.constant 0 : index
    %c0_19 = arith.constant 0 : index
    %22 = vector.load %arg8[%c0_17, %c0_18, %c0_19] : memref<10x16x4xf32, #tpu.memory_space<vmem>>, vector<10x16x4xf32>
    %23 = vector.extract_strided_slice %22 {offsets = [0, 0, 0], sizes = [10, 15, 4], strides = [1, 1, 1]} : vector<10x16x4xf32> to vector<10x15x4xf32>
    %24 = tpu.concatenate %21, %23 in 1 : vector<10x1x4xf32>, vector<10x15x4xf32> -> vector<10x16x4xf32>
    %25 = vector.extract_strided_slice %22 {offsets = [0, 1, 0], sizes = [10, 15, 4], strides = [1, 1, 1]} : vector<10x16x4xf32> to vector<10x15x4xf32>
    %26 = tpu.concatenate %25, %21 in 1 : vector<10x15x4xf32>, vector<10x1x4xf32> -> vector<10x16x4xf32>
    %27 = vector.extract_strided_slice %24 {offsets = [0, 0, 0], sizes = [8, 16, 4], strides = [1, 1, 1]} : vector<10x16x4xf32> to vector<8x16x4xf32>
    %28 = vector.extract_strided_slice %19 {offsets = [0, 0, 0], sizes = [1, 1, 4], strides = [1, 1, 1]} : vector<3x3x4xf32> to vector<1x1x4xf32>
    %29 = vector.shape_cast %28 : vector<1x1x4xf32> to vector<4xf32>
    %30 = vector.shape_cast %29 : vector<4xf32> to vector<1x1x4xf32>
    %31 = vector.broadcast %30 : vector<1x1x4xf32> to vector<8x16x4xf32>
    %32 = arith.mulf %27, %31 : vector<8x16x4xf32>
    %33 = vector.extract_strided_slice %22 {offsets = [0, 0, 0], sizes = [8, 16, 4], strides = [1, 1, 1]} : vector<10x16x4xf32> to vector<8x16x4xf32>
    %34 = vector.extract_strided_slice %19 {offsets = [0, 1, 0], sizes = [1, 1, 4], strides = [1, 1, 1]} : vector<3x3x4xf32> to vector<1x1x4xf32>
    %35 = vector.shape_cast %34 : vector<1x1x4xf32> to vector<4xf32>
    %36 = vector.shape_cast %35 : vector<4xf32> to vector<1x1x4xf32>
    %37 = vector.broadcast %36 : vector<1x1x4xf32> to vector<8x16x4xf32>
    %38 = arith.mulf %33, %37 : vector<8x16x4xf32>
    %39 = arith.addf %32, %38 : vector<8x16x4xf32>
    %40 = vector.extract_strided_slice %26 {offsets = [0, 0, 0], sizes = [8, 16, 4], strides = [1, 1, 1]} : vector<10x16x4xf32> to vector<8x16x4xf32>
    %41 = vector.extract_strided_slice %19 {offsets = [0, 2, 0], sizes = [1, 1, 4], strides = [1, 1, 1]} : vector<3x3x4xf32> to vector<1x1x4xf32>
    %42 = vector.shape_cast %41 : vector<1x1x4xf32> to vector<4xf32>
    %43 = vector.shape_cast %42 : vector<4xf32> to vector<1x1x4xf32>
    %44 = vector.broadcast %43 : vector<1x1x4xf32> to vector<8x16x4xf32>
    %45 = arith.mulf %40, %44 : vector<8x16x4xf32>
    %46 = arith.addf %39, %45 : vector<8x16x4xf32>
    %47 = vector.extract_strided_slice %24 {offsets = [1, 0, 0], sizes = [8, 16, 4], strides = [1, 1, 1]} : vector<10x16x4xf32> to vector<8x16x4xf32>
    %48 = vector.extract_strided_slice %19 {offsets = [1, 0, 0], sizes = [1, 1, 4], strides = [1, 1, 1]} : vector<3x3x4xf32> to vector<1x1x4xf32>
    %49 = vector.shape_cast %48 : vector<1x1x4xf32> to vector<4xf32>
    %50 = vector.shape_cast %49 : vector<4xf32> to vector<1x1x4xf32>
    %51 = vector.broadcast %50 : vector<1x1x4xf32> to vector<8x16x4xf32>
    %52 = arith.mulf %47, %51 : vector<8x16x4xf32>
    %53 = arith.addf %46, %52 : vector<8x16x4xf32>
    %54 = vector.extract_strided_slice %22 {offsets = [1, 0, 0], sizes = [8, 16, 4], strides = [1, 1, 1]} : vector<10x16x4xf32> to vector<8x16x4xf32>
    %55 = vector.extract_strided_slice %19 {offsets = [1, 1, 0], sizes = [1, 1, 4], strides = [1, 1, 1]} : vector<3x3x4xf32> to vector<1x1x4xf32>
    %56 = vector.shape_cast %55 : vector<1x1x4xf32> to vector<4xf32>
    %57 = vector.shape_cast %56 : vector<4xf32> to vector<1x1x4xf32>
    %58 = vector.broadcast %57 : vector<1x1x4xf32> to vector<8x16x4xf32>
    %59 = arith.mulf %54, %58 : vector<8x16x4xf32>
    %60 = arith.addf %53, %59 : vector<8x16x4xf32>
    %61 = vector.extract_strided_slice %26 {offsets = [1, 0, 0], sizes = [8, 16, 4], strides = [1, 1, 1]} : vector<10x16x4xf32> to vector<8x16x4xf32>
    %62 = vector.extract_strided_slice %19 {offsets = [1, 2, 0], sizes = [1, 1, 4], strides = [1, 1, 1]} : vector<3x3x4xf32> to vector<1x1x4xf32>
    %63 = vector.shape_cast %62 : vector<1x1x4xf32> to vector<4xf32>
    %64 = vector.shape_cast %63 : vector<4xf32> to vector<1x1x4xf32>
    %65 = vector.broadcast %64 : vector<1x1x4xf32> to vector<8x16x4xf32>
    %66 = arith.mulf %61, %65 : vector<8x16x4xf32>
    %67 = arith.addf %60, %66 : vector<8x16x4xf32>
    %68 = vector.extract_strided_slice %24 {offsets = [2, 0, 0], sizes = [8, 16, 4], strides = [1, 1, 1]} : vector<10x16x4xf32> to vector<8x16x4xf32>
    %69 = vector.extract_strided_slice %19 {offsets = [2, 0, 0], sizes = [1, 1, 4], strides = [1, 1, 1]} : vector<3x3x4xf32> to vector<1x1x4xf32>
    %70 = vector.shape_cast %69 : vector<1x1x4xf32> to vector<4xf32>
    %71 = vector.shape_cast %70 : vector<4xf32> to vector<1x1x4xf32>
    %72 = vector.broadcast %71 : vector<1x1x4xf32> to vector<8x16x4xf32>
    %73 = arith.mulf %68, %72 : vector<8x16x4xf32>
    %74 = arith.addf %67, %73 : vector<8x16x4xf32>
    %75 = vector.extract_strided_slice %22 {offsets = [2, 0, 0], sizes = [8, 16, 4], strides = [1, 1, 1]} : vector<10x16x4xf32> to vector<8x16x4xf32>
    %76 = vector.extract_strided_slice %19 {offsets = [2, 1, 0], sizes = [1, 1, 4], strides = [1, 1, 1]} : vector<3x3x4xf32> to vector<1x1x4xf32>
    %77 = vector.shape_cast %76 : vector<1x1x4xf32> to vector<4xf32>
    %78 = vector.shape_cast %77 : vector<4xf32> to vector<1x1x4xf32>
    %79 = vector.broadcast %78 : vector<1x1x4xf32> to vector<8x16x4xf32>
    %80 = arith.mulf %75, %79 : vector<8x16x4xf32>
    %81 = arith.addf %74, %80 : vector<8x16x4xf32>
    %82 = vector.extract_strided_slice %26 {offsets = [2, 0, 0], sizes = [8, 16, 4], strides = [1, 1, 1]} : vector<10x16x4xf32> to vector<8x16x4xf32>
    %83 = vector.extract_strided_slice %19 {offsets = [2, 2, 0], sizes = [1, 1, 4], strides = [1, 1, 1]} : vector<3x3x4xf32> to vector<1x1x4xf32>
    %84 = vector.shape_cast %83 : vector<1x1x4xf32> to vector<4xf32>
    %85 = vector.shape_cast %84 : vector<4xf32> to vector<1x1x4xf32>
    %86 = vector.broadcast %85 : vector<1x1x4xf32> to vector<8x16x4xf32>
    %87 = arith.mulf %82, %86 : vector<8x16x4xf32>
    %88 = arith.addf %81, %87 : vector<8x16x4xf32>
    %89 = vector.shape_cast %20 : vector<1x4xf32> to vector<1x1x4xf32>
    %90 = vector.broadcast %89 : vector<1x1x4xf32> to vector<8x16x4xf32>
    %91 = arith.addf %88, %90 : vector<8x16x4xf32>
    %cst_20 = arith.constant 0.000000e+00 : f32
    %92 = vector.broadcast %cst_20 : f32 to vector<8x16x4xf32>
    %93 = arith.maximumf %91, %92 : vector<8x16x4xf32>
    %c0_21 = arith.constant 0 : index
    %c0_22 = arith.constant 0 : index
    %c0_23 = arith.constant 0 : index
    %94 = vector.load %arg9[%c0_21, %c0_22, %c0_23] : memref<8x16x4xf32, #tpu.memory_space<vmem>>, vector<8x16x4xf32>
    tpu.vector_store %arg9[%c0_21, %c0_22, %c0_23], %93 {strides = array<i32>} : memref<8x16x4xf32, #tpu.memory_space<vmem>>, vector<8x16x4xf32>,
    %c0_24 = arith.constant 0 : index
    %c0_25 = arith.constant 0 : index
    %c0_26 = arith.constant 0 : index
    %95 = vector.load %arg9[%c0_24, %c0_25, %c0_26] : memref<8x16x4xf32, #tpu.memory_space<vmem>>, vector<8x16x4xf32>
    %96 = vector.shape_cast %95 : vector<8x16x4xf32> to vector<128x4xf32>
    %c0_27 = arith.constant 0 : index
    %c0_28 = arith.constant 0 : index
    %97 = vector.load %arg5[%c0_27, %c0_28] : memref<4x4xf32, #tpu.memory_space<vmem>>, vector<4x4xf32>
    %cst_29 = arith.constant dense<0.000000e+00> : vector<128x4xf32>
    %98 = tpu.matmul %96, %97, %cst_29 {dimension_numbers = #tpu.dot_dimension_numbers<[1], [0], [0], [1], [0, 0, 1, 1], [], []>} : vector<128x4xf32>, vector<4x4xf32>, vector<128x4xf32> -> vector<128x4xf32>
    %99 = vector.shape_cast %98 : vector<128x4xf32> to vector<8x16x4xf32>
    %c0_30 = arith.constant 0 : index
    %c0_31 = arith.constant 0 : index
    %100 = vector.load %arg6[%c0_30, %c0_31] : memref<1x4xf32, #tpu.memory_space<vmem>>, vector<1x4xf32>
    %101 = vector.shape_cast %100 : vector<1x4xf32> to vector<1x1x4xf32>
    %102 = vector.broadcast %101 : vector<1x1x4xf32> to vector<8x16x4xf32>
    %103 = arith.addf %99, %102 : vector<8x16x4xf32>
    %c1_32 = arith.constant 1 : index
    %c0_33 = arith.constant 0 : index
    %c0_34 = arith.constant 0 : index
    %104 = vector.load %arg8[%c1_32, %c0_33, %c0_34] : memref<10x16x4xf32, #tpu.memory_space<vmem>>, vector<8x16x4xf32>
    %105 = arith.addf %103, %104 : vector<8x16x4xf32>
    %c0_35 = arith.constant 0 : index
    %c0_36 = arith.constant 0 : index
    %c0_37 = arith.constant 0 : index
    %c0_38 = arith.constant 0 : index
    %106 = vector.load %arg7[%c0_35, %c0_36, %c0_37, %c0_38] : memref<1x8x16x4xf32, #tpu.memory_space<vmem>>, vector<1x8x16x4xf32>
    %107 = vector.shape_cast %106 : vector<1x8x16x4xf32> to vector<8x16x4xf32>
    %108 = vector.shape_cast %105 : vector<8x16x4xf32> to vector<1x8x16x4xf32>
    tpu.vector_store %arg7[%c0_35, %c0_36, %c0_37, %c0_38], %108 {strides = array<i32>} : memref<1x8x16x4xf32, #tpu.memory_space<vmem>>, vector<1x8x16x4xf32>,
    return
  }
  func.func @transform_0(%arg0: i32, %arg1: i32) -> (i32, i32, i32, i32) {
    %c0_i32 = arith.constant 0 : i32
    %c0_i32_0 = arith.constant 0 : i32
    %c0_i32_1 = arith.constant 0 : i32
    %c0_i32_2 = arith.constant 0 : i32
    return %arg0, %c0_i32, %c0_i32_0, %c0_i32_1 : i32, i32, i32, i32
  }
  func.func @transform_1(%arg0: i32, %arg1: i32) -> (i32, i32, i32) {
    %c0_i32 = arith.constant 0 : i32
    %c0_i32_0 = arith.constant 0 : i32
    %c0_i32_1 = arith.constant 0 : i32
    %c0_i32_2 = arith.constant 0 : i32
    return %c0_i32, %c0_i32_0, %c0_i32_1 : i32, i32, i32
  }
  func.func @transform_2(%arg0: i32, %arg1: i32) -> (i32, i32) {
    %c0_i32 = arith.constant 0 : i32
    %c0_i32_0 = arith.constant 0 : i32
    %c0_i32_1 = arith.constant 0 : i32
    return %c0_i32, %c0_i32_0 : i32, i32
  }
  func.func @transform_3(%arg0: i32, %arg1: i32) -> (i32, i32) {
    %c0_i32 = arith.constant 0 : i32
    %c0_i32_0 = arith.constant 0 : i32
    %c0_i32_1 = arith.constant 0 : i32
    return %c0_i32, %c0_i32_0 : i32, i32
  }
  func.func @transform_4(%arg0: i32, %arg1: i32) -> (i32, i32) {
    %c0_i32 = arith.constant 0 : i32
    %c0_i32_0 = arith.constant 0 : i32
    %c0_i32_1 = arith.constant 0 : i32
    return %c0_i32, %c0_i32_0 : i32, i32
  }
  func.func @transform_5(%arg0: i32, %arg1: i32) -> (i32, i32, i32, i32) {
    %c0_i32 = arith.constant 0 : i32
    %c0_i32_0 = arith.constant 0 : i32
    %c0_i32_1 = arith.constant 0 : i32
    return %arg0, %arg1, %c0_i32, %c0_i32_0 : i32, i32, i32, i32
  }
}

</mosaic_0001>

<bundles_post_ra>
// kernel: tpu_custom_call.1
= control target key start
LH: loop header
LB: loop body
LE: loop exit
PB: predicated region body
PF: predicated region fallthrough
CT: control target
= control target key end

     0   :  { %s1427_s18 = smov 0   ;;  %s1429_s19 = smov 0   ;;  %s2174_s0 = inlined_call_operand.vmem [shape: f32[2,16,16,4], index: 0, kind: input, shape index: {}]   ;;  %s2175_s1 = inlined_call_operand.vmem [shape: f32[3,3,4], index: 1, kind: input, shape index: {}]   ;;  %s2176_s2 = inlined_call_operand.vmem [shape: f32[1,4], index: 2, kind: input, shape index: {}]   ;;  %s2177_s3 = inlined_call_operand.vmem [shape: f32[4,4], index: 3, kind: input, shape index: {}]   ;;  %s2178_s4 = inlined_call_operand.vmem [shape: f32[1,4], index: 4, kind: input, shape index: {}]   ;;  %s2179_s5 = inlined_call_operand.vmem [shape: f32[2,16,16,4], index: 5, kind: output, shape index: {}]  }
   0x1   :  { %s1431_s20 = smov 0   ;;  %s1433_s21 = smov 0  }
   0x2   :  { %s1435_s22 = smov 0  }
   0x3 LB: > { %s24_s23 = sadd.s32 1, %s1386_s20  ;;  %s27_s24 = sadd.s32 1, %s1390_s21  ;;  %s1394_s22 = sphi %s1435_s22, %s15_s22   ;;  %s1390_s21 = sphi %s1433_s21, %s2218_s21   ;;  %s1386_s20 = sphi %s1431_s20, %s2217_s20   ;;  %s1382_s19 = sphi %s1429_s19, %s2216_s19   ;;  %s1378_s18 = sphi %s1427_s18, %s2215_s18  }
   0x4   : > { %p25_p0 = scmp.ge.s32.totalorder %s24_s23, 2  ;;  %p1229_p1 = scmp.ge.s32.totalorder %s1394_s22, 1 }
   0x5   : > { %p201_p2 = scmp.lt.s32.totalorder %s1394_s22, 5 }
   0x6   : > { %s2220_s23 = smov (%p25_p0, %s24_s23), 0  ;;  %s2222_s24 = smov (!%p25_p0, %s27_s24), %s1390_s21 }
   0x7   : > { %p202_p3 = pnand %p1229_p1, %p201_p2  ;;  %p29_p4 = scmp.ge.s32.totalorder %s2222_s24, 2 }
   0x9   : > { %s2224_s24 = smov (%p29_p4, %s2222_s24), 0  ;;  %205 = sbr.rel (%p202_p3) target bundleno = 379 (0x17b), region = 40 }
  0x10   : > { %vm251_vm0 = vcmask 31744   ;;  %p234_p5 = scmp.lt.s32.totalorder %s1382_s19, 1  ;;  %s1460_s25 = sshll.u32 %s1378_s18, 3  ;;  %v1396_v0 = vmov 0.0  }
  0x11   : > { %252 = vst.msk [vmem:[#allocation2] sm:$0xff] %vm251_vm0, %v1396_v0  ;;  %253 = vst.msk [vmem:[#allocation2 + $0x8] sm:$0xff] %vm251_vm0, %v1396_v0  ;;  %p242_p6 = scmp.lt.s32.totalorder %s1460_s25, 15  ;;  %s1268_s26 = sshll.u32 %s1378_s18, 7 }
  0x12   : > { %255 = vst.msk [vmem:[#allocation2 + $0x90] sm:$0xff] %vm251_vm0, %v1396_v0  ;;  %256 = vst.msk [vmem:[#allocation2 + $0x98] sm:$0xff] %vm251_vm0, %v1396_v0  ;;  %s2226_s19 = smov (!%p234_p5, %s1382_s19), 1  ;;  %p1238_p7 = scmp.le.s32.totalorder %s1378_s18, 0 }
  0x13   : > { %s243_s27 = scalar_select %p242_p6, %s1460_s25, 15 }
  0x14   : > { %s1267_s28 = sshll.u32 %s2226_s19, 8  ;;  %s1234_s29 = sshll.u32 %s2226_s19, 5 }
  0x15   : > { %s1472_s7 = scalar_lea.vmem %s2174_s0, %s1267_s28  ;;  %s1233_s8 = sshll.u32 %s243_s27, 1 }
  0x16   : > { %s246_s9 = sadd.s32 %s1234_s29, %s1233_s8  ;;  %s1475_s10 = scalar_lea.vmem %s1472_s7, %s1268_s26 }
  0x17   : > { %s1235_s11 = sshll.u32 %s246_s9, 3  ;;  %v259_v1 = vld [vmem:[%s1475_s10] sm:$0xff]  ;;  %v260_v2 = vld [vmem:[%s1475_s10 + $0x8] sm:$0xff]  ;;  %v261_v3 = vld [vmem:[%s1475_s10 + $0x10] sm:$0xff]  ;;  %s1239_s15 = sadd.s32 (!%p1238_p7), 4294967295, %s1460_s25 }
  0x18   : > { %s1483_s14 = scalar_lea.vmem %s2179_s5, %s1235_s11  ;;  %276 = vst.msk [vmem:[#allocation2 + $0x10] sm:$0xff] %vm251_vm0, %v259_v1  ;;  %277 = vst.msk [vmem:[#allocation2 + $0x18] sm:$0xff] %vm251_vm0, %v260_v2  ;;  %v262_v4 = vld [vmem:[%s1475_s10 + $0x18] sm:$0xff]  ;;  %v263_v5 = vld [vmem:[%s1475_s10 + $0x20] sm:$0xff]  ;;  %s1240_s16 = sshll.u32 (!%p1238_p7), %s1239_s15, 4 }
  0x19   : > { %278 = vst.msk [vmem:[#allocation2 + $0x20] sm:$0xff] %vm251_vm0, %v261_v3  ;;  %v264_v6 = vld [vmem:[%s1475_s10 + $0x28] sm:$0xff]  ;;  %279 = vst.msk [vmem:[#allocation2 + $0x28] sm:$0xff] %vm251_vm0, %v262_v4  ;;  %v265_v7 = vld [vmem:[%s1475_s10 + $0x30] sm:$0xff]  ;;  %295 = sbr.rel (%p1238_p7) target bundleno = 33 (0x21), region = 44  ;;  %s298_s17 = scalar_lea.vmem (!%p1238_p7), %s1472_s7, %s1240_s16 }
  0x1a   : > { %280 = vst.msk [vmem:[#allocation2 + $0x30] sm:$0xff] %vm251_vm0, %v263_v5  ;;  %281 = vst.msk [vmem:[#allocation2 + $0x38] sm:$0xff] %vm251_vm0, %v264_v6  ;;  %v266_v8 = vld [vmem:[%s1475_s10 + $0x38] sm:$0xff]  ;;  %v267_v9 = vld [vmem:[%s1475_s10 + $0x40] sm:$0xff] }
  0x1b   : > { %282 = vst.msk [vmem:[#allocation2 + $0x40] sm:$0xff] %vm251_vm0, %v265_v7  ;;  %283 = vst.msk [vmem:[#allocation2 + $0x48] sm:$0xff] %vm251_vm0, %v266_v8  ;;  %v268_v10 = vld [vmem:[%s1475_s10 + $0x48] sm:$0xff]  ;;  %v269_v11 = vld [vmem:[%s1475_s10 + $0x50] sm:$0xff] }
  0x1c   : > { %284 = vst.msk [vmem:[#allocation2 + $0x50] sm:$0xff] %vm251_vm0, %v267_v9  ;;  %v270_v12 = vld [vmem:[%s1475_s10 + $0x58] sm:$0xff]  ;;  %285 = vst.msk [vmem:[#allocation2 + $0x58] sm:$0xff] %vm251_vm0, %v268_v10  ;;  %v271_v13 = vld [vmem:[%s1475_s10 + $0x60] sm:$0xff] }
  0x1d   : > { %286 = vst.msk [vmem:[#allocation2 + $0x60] sm:$0xff] %vm251_vm0, %v269_v11  ;;  %287 = vst.msk [vmem:[#allocation2 + $0x68] sm:$0xff] %vm251_vm0, %v270_v12  ;;  %v272_v14 = vld [vmem:[%s1475_s10 + $0x68] sm:$0xff]  ;;  %v273_v15 = vld [vmem:[%s1475_s10 + $0x70] sm:$0xff] }
  0x1e   : > { %288 = vst.msk [vmem:[#allocation2 + $0x70] sm:$0xff] %vm251_vm0, %v271_v13  ;;  %289 = vst.msk [vmem:[#allocation2 + $0x78] sm:$0xff] %vm251_vm0, %v272_v14  ;;  %v274_v16 = vld [vmem:[%s1475_s10 + $0x78] sm:$0xff]  ;;  %v299_v17 = vld [vmem:[%s298_s17] sm:$0xff] (!%p1238_p7) }
  0x1f   : > { %290 = vst.msk [vmem:[#allocation2 + $0x80] sm:$0xff] %vm251_vm0, %v273_v15  ;;  %291 = vst.msk [vmem:[#allocation2 + $0x88] sm:$0xff] %vm251_vm0, %v274_v16  ;;  %v300_v18 = vld [vmem:[%s298_s17 + $0x8] sm:$0xff] (!%p1238_p7) }
  0x20   : > { %301 = vst.msk [vmem:[#allocation2] sm:$0xff] %vm251_vm0, %v299_v17  ;;  %302 = vst.msk [vmem:[#allocation2 + $0x8] sm:$0xff] %vm251_vm0, %v300_v18 }
  0x21 PF: > { %p1241_p8 = scmp.ge.s32.totalorder %s1378_s18, 1 }
  0x22   : > { %v1244_v19 = vld [vmem:[%s1475_s10 + $0x80] sm:$0xff] (!%p1241_p8)  ;;  %v1245_v20 = vld [vmem:[%s1475_s10 + $0x88] sm:$0xff] (!%p1241_p8) }
  0x23   : > { %306 = sbr.rel (%p1241_p8) target bundleno = 42 (0x2a), region = 48  ;;  %312 = vst.msk [vmem:[#allocation2 + $0x90] sm:$0xff] (!%p1241_p8), %vm251_vm0, %v1244_v19  ;;  %313 = vst.msk [vmem:[#allocation2 + $0x98] sm:$0xff] (!%p1241_p8), %vm251_vm0, %v1245_v20 }
  0x2a PF: > { %v858_v21 = vld [vmem:[%s2177_s3] sm:$0xf]  ;;  %vm907_vm1 = vcmask 1043456   ;;  %v480_v23 = vlaneseq  ;;  %v1529_v24 = vld [vmem:[#allocation2 + $0x8] sm:$0xff]  ;;  %v1531_v25 = vld [vmem:[#allocation2 + $0x10] sm:$0xff]  ;;  %vm358_vm2 = vcmask 1040384  }
  0x2b   : > { %v1527_v22 = vld [vmem:[#allocation2] sm:$0xff]  ;;  %1287 = vmatprep.subr.msk.mxu0 %vm907_vm1, %v858_v21  ;;  %1313 = vmatprep.subr.msk.mxu1 %vm907_vm1, %v858_v21  ;;  %2194 = vst [vmem:[#allocation4_spill] sm:$0xff] %v1531_v25  ;;  %v1533_v26 = vld [vmem:[#allocation2 + $0x18] sm:$0xff]  ;;  %v1538_v29 = vld [vmem:[#allocation2 + $0x28] sm:$0xff]  ;;  %v362_v30 = vrot.slane %v1531_v25, 7  ;;  %vm419_vm3 = vcmask 1046528  }
  0x2c   : > { %1288 = vmatpush3.msk.msra.mxu0 %vm907_vm1, %v858_v21  ;;  %1314 = vmatpush3.msk.msra.mxu1 %vm907_vm1, %v858_v21  ;;  %v359_v27 = vrot.slane %v1527_v22, 7  ;;  %v1536_v28 = vld [vmem:[#allocation2 + $0x20] sm:$0xff]  ;;  %v420_v31 = vrot.slane %v1527_v22, 1  ;;  %v421_v32 = vrot.slane %v1529_v24, 1  ;;  %v423_v34 = vrot.slane %v1531_v25, 1  ;;  %v1553_v41 = vld [vmem:[#allocation2 + $0x50] sm:$0xff] }
  0x2d   : > { %2195 = vst [vmem:[#allocation5_spill] sm:$0xff] %v1536_v28  ;;  %v365_v33 = vrot.slane %v1536_v28, 7  ;;  %v424_v35 = vrot.slane %v1533_v26, 1  ;;  %v426_v36 = vrot.slane %v1536_v28, 1  ;;  %v1547_v37 = vld [vmem:[#allocation2 + $0x40] sm:$0xff]  ;;  %v427_v39 = vrot.slane %v1538_v29, 1 }
  0x2e   : > { %v314_v38 = vld [vmem:[%s2175_s1] sm:$0x7]  ;;  %v481_v40 = vshrl.u32 %v480_v23, 7  ;;  %2196 = vst [vmem:[#allocation6_spill] sm:$0xff] %v1553_v41  ;;  %v315_v42 = vld [vmem:[%s2175_s1 + $0x4] sm:$0x7]  ;;  %v422_v46 = vsel %vm419_vm3, %v420_v31, %v421_v32 }
  0x2f   : > { %v409_v43 = vsel %vm358_vm2, 0.0, %v359_v27  ;;  %v410_v44 = vsel %vm358_vm2, 0.0, %v362_v30  ;;  %v371_v45 = vrot.slane %v1547_v37, 7  ;;  %v1568_v50 = vld [vmem:[#allocation2 + $0x60] sm:$0xff]  ;;  %v411_v51 = vsel %vm358_vm2, 0.0, %v365_v33  ;;  %v1627_v16 = vld [vmem:[#allocation2 + $0x48] sm:$0xff] }
  0x30   : > { %v482_v47 = vsub.s32 0, %v481_v40  ;;  %v502_v48 = vsub.s32 1, %v481_v40  ;;  %v538_v49 = vsub.s32 2, %v481_v40  ;;  %v425_v52 = vsel %vm419_vm3, %v423_v34, %v424_v35  ;;  %v316_v55 = vld [vmem:[%s2175_s1 + $0x8] sm:$0x7]  ;;  %2198 = vst [vmem:[#allocation8_spill] sm:$0xff] %v1627_v16 }
  0x31   : > { %v428_v53 = vsel %vm419_vm3, %v426_v36, %v427_v39  ;;  %v374_v54 = vrot.slane %v1553_v41, 7  ;;  %v377_v62 = vrot.slane %v1568_v50, 7  ;;  %v1599_v63 = vsel %vm358_vm2, 0.0, %v371_v45  ;;  %v1629_v17 = vld [vmem:[#allocation2 + $0x58] sm:$0xff]  ;;  %v1633_v23 = vld [vmem:[#allocation2 + $0x68] sm:$0xff] }
  0x32   : > { %v1583_v56 = vrot.slane %v314_v38, %v482_v47  ;;  %v1585_v57 = vrot.slane %v314_v38, %v502_v48  ;;  %v1587_v58 = vrot.slane %v314_v38, %v538_v49  ;;  %v1589_v59 = vrot.slane %v315_v42, %v482_v47 }
  0x33   : > { %v1591_v60 = vrot.slane %v315_v42, %v502_v48  ;;  %v1593_v61 = vrot.slane %v315_v42, %v538_v49  ;;  %v1611_v7 = vrot.slane %v316_v55, %v482_v47  ;;  %v1617_v10 = vsel %vm358_vm2, 0.0, %v374_v54 }
  0x34   : > { %v484_v0 = vmul.f32 %v1583_v56, %v409_v43  ;;  %v486_v1 = vmul.f32 %v1583_v56, %v410_v44  ;;  %v488_v2 = vmul.f32 %v1583_v56, %v411_v51  ;;  %v504_v3 = vmul.f32 %v1585_v57, %v1527_v22  ;;  %2197 = vst [vmem:[#allocation7_spill] sm:$0xff] %v1617_v10 }
  0x35   : > { %v506_v4 = vmul.f32 %v1585_v57, %v1531_v25  ;;  %v508_v5 = vmul.f32 %v1585_v57, %v1536_v28  ;;  %v540_v6 = vmul.f32 %v1587_v58, %v422_v46  ;;  %v576_v9 = vmul.f32 %v1589_v59, %v410_v44 }
  0x36   : > { %v520_v8 = vadd.f32 %v504_v3, %v484_v0  ;;  %v432_v11 = vrot.slane %v1547_v37, 1  ;;  %v542_v12 = vmul.f32 %v1587_v58, %v425_v52  ;;  %v544_v13 = vmul.f32 %v1587_v58, %v428_v53 }
  0x37   : > { %v1623_v14 = vmul.f32 %v1589_v59, %v411_v51  ;;  %v1625_v15 = vrot.slane %v316_v55, %v502_v48  ;;  %v522_v18 = vadd.f32 %v506_v4, %v486_v1  ;;  %v524_v19 = vadd.f32 %v508_v5, %v488_v2 }
  0x38   : > { %v556_v20 = vadd.f32 %v540_v6, %v520_v8  ;;  %v612_v21 = vmul.f32 %v1591_v60, %v1531_v25  ;;  %v648_v31 = vmul.f32 %v1593_v61, %v425_v52  ;;  %v1637_v34 = vmul.f32 %v1593_v61, %v428_v53 }
  0x39   : > { %v684_v36 = vmul.f32 %v1611_v7, %v411_v51  ;;  %v415_v38 = vsel %vm358_vm2, 0.0, %v377_v62  ;;  %v433_v42 = vrot.slane %v1627_v16, 1  ;;  %v435_v43 = vrot.slane %v1553_v41, 1 }
  0x3a   : > { %v592_v40 = vadd.f32 %v576_v9, %v556_v20  ;;  %v2180_v44 = vrot.slane %v1629_v17, 1  ;;  %v1646_v46 = vrot.slane %v316_v55, %v538_v49  ;;  %v438_v47 = vrot.slane %v1568_v50, 1 }
  0x3b   : > { %v439_v48 = vrot.slane %v1633_v23, 1  ;;  %v492_v51 = vmul.f32 %v1583_v56, %v1599_v63  ;;  %v720_v0 = vmul.f32 %v1625_v15, %v1536_v28  ;;  %v1657_v1 = vsel %vm419_vm3, %v432_v11, %v433_v42 }
  0x3c   : > { %v628_v52 = vadd.f32 %v612_v21, %v592_v40  ;;  %v1662_v49 = vsel %vm419_vm3, %v435_v43, %v2180_v44  ;;  %v496_v2 = vmul.f32 %v1583_v56, %v415_v38  ;;  %v512_v3 = vmul.f32 %v1585_v57, %v1547_v37 }
  0x3d   : > { %2199 = vst [vmem:[#allocation9_spill] sm:$0xff] %v1662_v49  ;;  %v440_v55 = vsel %vm419_vm3, %v438_v47, %v439_v48  ;;  %v516_v4 = vmul.f32 %v1585_v57, %v1568_v50  ;;  %v1672_v5 = vadd.f32 %v542_v12, %v522_v18  ;;  %v1674_v6 = vadd.f32 %v544_v13, %v524_v19 }
  0x3e   : > { %v664_v8 = vadd.f32 %v648_v31, %v628_v52  ;;  %v548_v9 = vmul.f32 %v1587_v58, %v1657_v1  ;;  %v756_v11 = vmul.f32 %v1646_v46, %v428_v53  ;;  %v1681_v20 = vmul.f32 %v1583_v56, %v1617_v10 }
  0x3f   : > { %v528_v21 = vadd.f32 %v512_v3, %v492_v51  ;;  %v584_v40 = vmul.f32 %v1589_v59, %v1617_v10  ;;  %v532_v47 = vadd.f32 %v516_v4, %v496_v2  ;;  %v1687_v12 = vmul.f32 %v1587_v58, %v1662_v49  ;;  %v1705_v3 = vld [vmem:[%s2176_s2] ss:$0 sm:$0xff] }
  0x40   : > { %v700_v43 = vadd.f32 %v684_v36, %v664_v8  ;;  %v552_v13 = vmul.f32 %v1587_v58, %v440_v55  ;;  %v1691_v19 = vmul.f32 %v1589_v59, %v415_v38  ;;  %v620_v53 = vmul.f32 %v1591_v60, %v1553_v41 }
  0x41   : > { %v564_v18 = vadd.f32 %v548_v9, %v528_v21  ;;  %v656_v31 = vmul.f32 %v1593_v61, %v1662_v49  ;;  %v1698_v36 = vmul.f32 %v1593_v61, %v440_v55  ;;  %v360_v52 = vrot.slane %v1529_v24, 7  ;;  %v1815_v49 = vld [vmem:[#allocation2 + $0x38] sm:$0xff] }
  0x42   : > { %v736_v51 = vadd.f32 %v720_v0, %v700_v43  ;;  %v363_v2 = vrot.slane %v1533_v26, 7  ;;  %v692_v8 = vmul.f32 %v1611_v7, %v415_v38  ;;  %v366_v9 = vrot.slane %v1538_v29, 7 }
  0x43   : > { %v600_v4 = vadd.f32 %v584_v40, %v564_v18  ;;  %v470_v0 = vsel %vm419_vm3, %v421_v32, 0.0  ;;  %v361_v43 = vsel %vm358_vm2, %v359_v27, %v360_v52  ;;  %v471_v40 = vsel %vm419_vm3, %v424_v35, 0.0 }
  0x44   : > { %v772_v21 = vadd.f32 %v756_v11, %v736_v51  ;;  %v364_v44 = vsel %vm358_vm2, %v362_v30, %v363_v2  ;;  %v367_v18 = vsel %vm358_vm2, %v365_v33, %v366_v9  ;;  %v472_v32 = vsel %vm419_vm3, %v427_v39, 0.0 }
  0x45   : > { %v636_v38 = vadd.f32 %v620_v53, %v600_v4  ;;  %v485_v22 = vmul.f32 %v1583_v56, %v361_v43  ;;  %v489_v11 = vmul.f32 %v1583_v56, %v367_v18  ;;  %v505_v30 = vmul.f32 %v1585_v57, %v1529_v24 }
  0x46   : > { %v794_v27 = vadd.f32 %v1705_v3, %v772_v21  ;;  %v509_v35 = vmul.f32 %v1585_v57, %v1538_v29  ;;  %v1734_v53 = vadd.f32 %v552_v13, %v532_v47  ;;  %v728_v33 = vmul.f32 %v1625_v15, %v1568_v50 }
  0x47   : > { %v672_v51 = vadd.f32 %v656_v31, %v636_v38  ;;  %v541_v39 = vmul.f32 %v1587_v58, %v470_v0  ;;  %v764_v2 = vmul.f32 %v1646_v46, %v440_v55  ;;  %v521_v4 = vadd.f32 %v505_v30, %v485_v22 }
  0x48   : > { %v810_v52 = vmax.f32 %v794_v27, 0.0  ;;  %v577_v9 = vmul.f32 %v1589_v59, %v364_v44  ;;  %v1742_v24 = vmul.f32 %v1583_v56, %v364_v44  ;;  %v1745_v43 = vmul.f32 %v1587_v58, %v471_v40 }
  0x49   : > { %v708_v21 = vadd.f32 %v692_v8, %v672_v51  ;;  %v545_v47 = vmul.f32 %v1587_v58, %v472_v32  ;;  %v525_v13 = vadd.f32 %v509_v35, %v489_v11  ;;  %v557_v31 = vadd.f32 %v541_v39, %v521_v4 }
  0x4a   : > { %826 = vst.msk [vmem:[#allocation3] sm:$0xff] %vm251_vm0, %v810_v52  ;;  %v1750_v0 = vmul.f32 %v1589_v59, %v367_v18  ;;  %v613_v55 = vmul.f32 %v1591_v60, %v1533_v26  ;;  %v649_v8 = vmul.f32 %v1593_v61, %v471_v40  ;;  %v685_v44 = vmul.f32 %v1611_v7, %v367_v18 }
  0x4b   : > { %v744_v38 = vadd.f32 %v728_v33, %v708_v21  ;;  %v372_v22 = vrot.slane %v1627_v16, 7  ;;  %v593_v27 = vadd.f32 %v577_v9, %v557_v31  ;;  %v721_v30 = vmul.f32 %v1625_v15, %v1538_v29 }
  0x4c   : > { %v375_v11 = vrot.slane %v1629_v17, 7  ;;  %v378_v35 = vrot.slane %v1633_v23, 7  ;;  %v1769_v40 = vsel %vm419_vm3, %v433_v42, 0.0  ;;  %v1774_v18 = vsel %vm419_vm3, %v439_v48, 0.0 }
  0x4d   : > { %v780_v51 = vadd.f32 %v764_v2, %v744_v38  ;;  %v1764_v39 = vsel %vm358_vm2, %v371_v45, %v372_v22  ;;  %2200 = vst [vmem:[#allocation10_spill] sm:$0xff] %v1769_v40  ;;  %v629_v33 = vadd.f32 %v613_v55, %v593_v27  ;;  %v513_v4 = vmul.f32 %v1585_v57, %v1627_v16 }
  0x4e   : > { %v1779_v52 = vsel %vm358_vm2, %v374_v54, %v375_v11  ;;  %v1784_v45 = vsel %vm358_vm2, %v377_v62, %v378_v35  ;;  %v493_v42 = vmul.f32 %v1583_v56, %v1764_v39  ;;  %v517_v54 = vmul.f32 %v1585_v57, %v1633_v23 }
  0x4f   : > { %v802_v2 = vadd.f32 %v1705_v3, %v780_v51  ;;  %v497_v48 = vmul.f32 %v1583_v56, %v1784_v45  ;;  %v665_v9 = vadd.f32 %v649_v8, %v629_v33  ;;  %v2201_v21 = vrot.slane %v1629_v17, 1  ;;  %v1806_v51 = vld [vmem:[#allocation2 + $0x30] sm:$0xff] }
  0x50   : > { %v549_v31 = vmul.f32 %v1587_v58, %v1769_v40  ;;  %v553_v55 = vmul.f32 %v1587_v58, %v1774_v18  ;;  %v529_v27 = vadd.f32 %v513_v4, %v493_v42  ;;  %v585_v35 = vmul.f32 %v1589_v59, %v1779_v52 }
  0x51   : > { %v1798_v62 = vsel %vm419_vm3, %v2201_v21, 0.0  ;;  %v842_v38 = vld [vmem:[#allocation3] sm:$0xff]  ;;  %v818_v22 = vmax.f32 %v802_v2, 0.0  ;;  %v533_v11 = vadd.f32 %v517_v54, %v497_v48  ;;  %v1809_v8 = vadd.f32 %v545_v47, %v525_v13 }
  0x52   : > { %2202 = vst [vmem:[#allocation11_spill] sm:$0xff] %v1798_v62  ;;  %1289 = vmatprep.mubr.msk.f32.mxu0 %vm251_vm0, %v842_v38  ;;  %v1812_v33 = vmul.f32 %v1593_v61, %v472_v32  ;;  %v701_v21 = vadd.f32 %v685_v44, %v665_v9  ;;  %v757_v25 = vmul.f32 %v1646_v46, %v472_v32  ;;  %v2184_v4 = vrot.slane %v1806_v51, 7 }
  0x53   : > { %834 = vst.msk [vmem:[#allocation3 + $0x40] sm:$0xff] %vm251_vm0, %v818_v22  ;;  %v1820_v42 = vmul.f32 %v1587_v58, %v1798_v62  ;;  %v565_v2 = vadd.f32 %v549_v31, %v529_v27  ;;  %v1822_v48 = vadd.f32 %v553_v55, %v533_v11  ;;  %v621_v47 = vmul.f32 %v1591_v60, %v1629_v17 }
  0x54   : > { %v737_v13 = vadd.f32 %v721_v30, %v701_v21  ;;  %v657_v44 = vmul.f32 %v1593_v61, %v1798_v62  ;;  %v693_v32 = vmul.f32 %v1611_v7, %v1784_v45  ;;  %v429_v9 = vrot.slane %v1806_v51, 1  ;;  %v1846_v62 = vld [vmem:[#allocation2 + $0x70] sm:$0xff] }
  0x55   : > { %2203 = vst [vmem:[#allocation12_spill] sm:$0xff] %v1822_v48  ;;  %v601_v54 = vadd.f32 %v585_v35, %v565_v2  ;;  %v430_v38 = vrot.slane %v1815_v49, 1  ;;  %v510_v31 = vmul.f32 %v1585_v57, %v1806_v51  ;;  %v412_v30 = vsel %vm358_vm2, 0.0, %v2184_v4  ;;  %v1852_v4 = vld [vmem:[#allocation2 + $0x78] sm:$0xff] }
  0x56   : > { %v773_v55 = vadd.f32 %v757_v25, %v737_v13  ;;  %v594_v22 = vadd.f32 %v1623_v14, %v1672_v5  ;;  %v614_v27 = vmul.f32 %v1591_v60, %v1536_v28  ;;  %v729_v35 = vmul.f32 %v1625_v15, %v1633_v23 }
  0x57   : > { %v637_v11 = vadd.f32 %v621_v47, %v601_v54  ;;  %v431_v21 = vsel %vm419_vm3, %v429_v9, %v430_v38  ;;  %v490_v2 = vmul.f32 %v1583_v56, %v412_v30  ;;  %v765_v13 = vmul.f32 %v1646_v46, %v1774_v18 }
  0x58   : > { %v795_v25 = vadd.f32 %v1705_v3, %v773_v55  ;;  %v546_v14 = vmul.f32 %v1587_v58, %v431_v21  ;;  %v630_v5 = vadd.f32 %v614_v27, %v594_v22  ;;  %v686_v28 = vmul.f32 %v1611_v7, %v412_v30 }
  0x59   : > { %v673_v47 = vadd.f32 %v657_v44, %v637_v11  ;;  %v526_v54 = vadd.f32 %v510_v31, %v490_v2  ;;  %v722_v9 = vmul.f32 %v1625_v15, %v1806_v51  ;;  %v758_v55 = vmul.f32 %v1646_v46, %v431_v21 }
  0x5a   : > { %v850_v10 = vld [vmem:[#allocation3 + $0x40] sm:$0xff]  ;;  %v811_v40 = vmax.f32 %v795_v25, 0.0  ;;  %v666_v48 = vadd.f32 %v1637_v34, %v630_v5  ;;  %v2191_v16 = vrot.slane %v1846_v62, 7  ;;  %v441_v44 = vrot.slane %v1846_v62, 1 }
  0x5b   : > { %1301 = vmatprep.mubr.msk.f32.mxu1 %vm251_vm0, %v850_v10  ;;  %v709_v22 = vadd.f32 %v693_v32, %v673_v47  ;;  %v1861_v27 = vadd.f32 %v546_v14, %v526_v54  ;;  %v442_v31 = vrot.slane %v1852_v4, 1  ;;  %v514_v2 = vmul.f32 %v1585_v57, %v1553_v41 }
  0x5c   : > { %827 = vst.msk [vmem:[#allocation3 + $0x8] sm:$0xff] %vm251_vm0, %v811_v40  ;;  %v702_v11 = vadd.f32 %v686_v28, %v666_v48  ;;  %v416_v34 = vsel %vm358_vm2, 0.0, %v2191_v16  ;;  %v518_v10 = vmul.f32 %v1585_v57, %v1846_v62  ;;  %v1875_v32 = vmul.f32 %v1589_v59, %v1784_v45 }
  0x5d   : > { %v745_v25 = vadd.f32 %v729_v35, %v709_v22  ;;  %v443_v14 = vsel %vm419_vm3, %v441_v44, %v442_v31  ;;  %v498_v40 = vmul.f32 %v1583_v56, %v416_v34  ;;  %v1881_v28 = vmul.f32 %v1593_v61, %v1774_v18 }
  0x5e   : > { %v738_v48 = vadd.f32 %v722_v9, %v702_v11  ;;  %v530_v5 = vadd.f32 %v514_v2, %v1681_v20  ;;  %v554_v47 = vmul.f32 %v1587_v58, %v443_v14  ;;  %v1886_v16 = vmul.f32 %v1589_v59, %v412_v30 }
  0x5f   : > { %v781_v54 = vadd.f32 %v765_v13, %v745_v25  ;;  %v1889_v45 = vmul.f32 %v1593_v61, %v431_v21  ;;  %v534_v35 = vadd.f32 %v518_v10, %v498_v40  ;;  %v1893_v41 = vmul.f32 %v1589_v59, %v416_v34 }
  0x60   : > { %v774_v22 = vadd.f32 %v758_v55, %v738_v48  ;;  %v566_v44 = vadd.f32 %v1687_v12, %v530_v5  ;;  %v622_v18 = vmul.f32 %v1591_v60, %v1568_v50  ;;  %v369_v30 = vrot.slane %v1815_v49, 7 }
  0x61   : > { %v803_v20 = vadd.f32 %v1705_v3, %v781_v54  ;;  %v1898_v9 = vadd.f32 %v554_v47, %v534_v35  ;;  %v473_v13 = vsel %vm419_vm3, %v430_v38, 0.0  ;;  %v507_v12 = vmul.f32 %v1585_v57, %v1533_v26 }
  0x62   : > { %v796_v21 = vadd.f32 %v1705_v3, %v774_v22  ;;  %v602_v55 = vadd.f32 %v1691_v19, %v566_v44  ;;  %v511_v11 = vmul.f32 %v1585_v57, %v1815_v49  ;;  %v694_v25 = vmul.f32 %v1611_v7, %v416_v34 }
  0x63   : > { %v843_v2 = vld [vmem:[#allocation3 + $0x8] sm:$0xff]  ;;  %v819_v10 = vmax.f32 %v803_v20, 0.0  ;;  %v2204_v40 = vrot.slane %v1806_v51, 7  ;;  %v547_v38 = vmul.f32 %v1587_v58, %v473_v13  ;;  %v523_v54 = vadd.f32 %v507_v12, %v1742_v24 }
  0x64   : > { %1290 = vmatmul.mubr.msk.f32.vlgmr.msra.gmra.mrb[0].mxu0 %vm251_vm0, %v843_v2  ;;  %v812_v5 = vmax.f32 %v796_v21, 0.0  ;;  %v638_v19 = vadd.f32 %v622_v18, %v602_v55  ;;  %v1918_v35 = vmul.f32 %v1593_v61, %v443_v14  ;;  %v730_v34 = vmul.f32 %v1625_v15, %v1846_v62 }
  0x65   : > { %v370_v48 = vsel %vm358_vm2, %v2204_v40, %v369_v30  ;;  %835 = vst.msk [vmem:[#allocation3 + $0x48] sm:$0xff] %vm251_vm0, %v819_v10  ;;  %v766_v22 = vmul.f32 %v1646_v46, %v443_v14  ;;  %v615_v44 = vmul.f32 %v1591_v60, %v1538_v29  ;;  %v559_v24 = vadd.f32 %v1745_v43, %v523_v54 }
  0x66   : > { %v491_v47 = vmul.f32 %v1583_v56, %v370_v48  ;;  %828 = vst.msk [vmem:[#allocation3 + $0x10] sm:$0xff] %vm251_vm0, %v812_v5  ;;  %v674_v18 = vadd.f32 %v1698_v36, %v638_v19  ;;  %v1929_v30 = vmul.f32 %v1589_v59, %v370_v48  ;;  %v381_v21 = vrot.slane %v1852_v4, 7 }
  0x67   : > { %v477_v55 = vsel %vm419_vm3, %v442_v31, 0.0  ;;  %v495_v14 = vmul.f32 %v1583_v56, %v1779_v52  ;;  %v515_v12 = vmul.f32 %v1585_v57, %v1629_v17  ;;  %v595_v36 = vadd.f32 %v1750_v0, %v559_v24 }
  0x68   : > { %v527_v20 = vadd.f32 %v511_v11, %v491_v47  ;;  %v710_v2 = vadd.f32 %v694_v25, %v674_v18  ;;  %v519_v43 = vmul.f32 %v1585_v57, %v1852_v4  ;;  %v1943_v11 = vmul.f32 %v1593_v61, %v473_v13 }
  0x69   : > { %v687_v40 = vmul.f32 %v1611_v7, %v370_v48  ;;  %v2205_v31 = vrot.slane %v1846_v62, 7  ;;  %v531_v19 = vadd.f32 %v515_v12, %v495_v14  ;;  %v631_v54 = vadd.f32 %v615_v44, %v595_v36 }
  0x6a   : > { %v1937_v10 = vadd.f32 %v547_v38, %v527_v20  ;;  %v746_v47 = vadd.f32 %v730_v34, %v710_v2  ;;  %v555_v38 = vmul.f32 %v1587_v58, %v477_v55  ;;  %v723_v0 = vmul.f32 %v1625_v15, %v1815_v49 }
  0x6b   : > { %v382_v5 = vsel %vm358_vm2, %v2205_v31, %v381_v21  ;;  %v759_v57 = vmul.f32 %v1646_v46, %v473_v13  ;;  %v567_v18 = vadd.f32 %v1820_v42, %v531_v19  ;;  %v623_v48 = vmul.f32 %v1591_v60, %v1633_v23 }
  0x6c   : > { %v499_v25 = vmul.f32 %v1583_v56, %v382_v5  ;;  %v851_v20 = vld [vmem:[#allocation3 + $0x48] sm:$0xff]  ;;  %v782_v24 = vadd.f32 %v766_v22, %v746_v47  ;;  %v667_v21 = vadd.f32 %v1812_v33, %v631_v54  ;;  %v589_v44 = vmul.f32 %v1589_v59, %v382_v5  ;;  %v1959_v56 = vld [vmem:[#allocation2 + $0x80] sm:$0xff] }
  0x6d   : > { %1302 = vmatmul.mubr.msk.f32.vlgmr.msra.gmra.mrb[0].mxu1 %vm251_vm0, %v851_v20  ;;  %v844_v58 = vld [vmem:[#allocation3 + $0x10] sm:$0xff]  ;;  %v603_v14 = vadd.f32 %v1875_v32, %v567_v18  ;;  %v695_v13 = vmul.f32 %v1611_v7, %v382_v5  ;;  %v596_v42 = vadd.f32 %v1886_v16, %v1674_v6  ;;  %v616_v22 = vmul.f32 %v1591_v60, %v1806_v51  ;;  %v1976_v5 = vld [vmem:[#allocation2 + $0x88] sm:$0xff] }
  0x6e   : > { %v535_v34 = vadd.f32 %v519_v43, %v499_v25  ;;  %1292 = vmatprep.mubr.msk.f32.mxu0 %vm251_vm0, %v844_v58  ;;  %v804_v33 = vadd.f32 %v1705_v3, %v782_v24  ;;  %v703_v12 = vadd.f32 %v687_v40, %v667_v21  ;;  %v731_v36 = vmul.f32 %v1625_v15, %v1852_v4 }
  0x6f   : > { %v639_v43 = vadd.f32 %v623_v48, %v603_v14  ;;  %v632_v32 = vadd.f32 %v616_v22, %v596_v42  ;;  %v688_v31 = vmul.f32 %v1611_v7, %v1599_v63  ;;  %v383_v16 = vrot.slane %v1959_v56, 7 }
  0x70   : > { %v1970_v2 = vadd.f32 %v555_v38, %v535_v34  ;;  %v820_v6 = vmax.f32 %v804_v33, 0.0  ;;  %v739_v19 = vadd.f32 %v723_v0, %v703_v12  ;;  %v444_v47 = vrot.slane %v1959_v56, 1 }
  0x71   : > { %v445_v40 = vrot.slane %v1976_v5, 1  ;;  %v675_v54 = vadd.f32 %v1881_v28, %v639_v43  ;;  %v668_v25 = vadd.f32 %v1889_v45, %v632_v32  ;;  %v724_v38 = vmul.f32 %v1625_v15, %v1547_v37 }
  0x72   : > { %v604_v18 = vadd.f32 %v1893_v41, %v1734_v53  ;;  %836 = vst.msk [vmem:[#allocation3 + $0x50] sm:$0xff] %vm251_vm0, %v820_v6  ;;  %v775_v48 = vadd.f32 %v759_v57, %v739_v19  ;;  %v661_v20 = vmul.f32 %v1593_v61, %v477_v55  ;;  %v767_v0 = vmul.f32 %v1646_v46, %v477_v55 }
  0x73   : > { %v624_v24 = vmul.f32 %v1591_v60, %v1846_v62  ;;  %v711_v21 = vadd.f32 %v695_v13, %v675_v54  ;;  %v704_v28 = vadd.f32 %v688_v31, %v668_v25  ;;  %v760_v45 = vmul.f32 %v1646_v46, %v1657_v1 }
  0x74   : > { %v417_v34 = vsel %vm358_vm2, 0.0, %v383_v16  ;;  %v797_v58 = vadd.f32 %v1705_v3, %v775_v48  ;;  %v446_v41 = vsel %vm419_vm3, %v444_v47, %v445_v40  ;;  %v597_v55 = vadd.f32 %v1929_v30, %v1809_v8  ;;  %v2206_v30 = vld [vmem:[#allocation8_spill] sm:$0xff] }
  0x75   : > { %v640_v53 = vadd.f32 %v624_v24, %v604_v18  ;;  %v696_v57 = vmul.f32 %v1611_v7, %v417_v34  ;;  %v747_v14 = vadd.f32 %v731_v36, %v711_v21  ;;  %v740_v42 = vadd.f32 %v724_v38, %v704_v28 }
  0x76   : > { %v617_v13 = vmul.f32 %v1591_v60, %v1815_v49  ;;  %v813_v22 = vmax.f32 %v797_v58, 0.0  ;;  %v732_v12 = vmul.f32 %v1625_v15, %v1959_v56  ;;  %v768_v43 = vmul.f32 %v1646_v46, %v446_v41 }
  0x77   : > { %v676_v33 = vadd.f32 %v1918_v35, %v640_v53  ;;  %v783_v32 = vadd.f32 %v767_v0, %v747_v14  ;;  %v776_v31 = vadd.f32 %v760_v45, %v740_v42  ;;  %v689_v36 = vmul.f32 %v1611_v7, %v1764_v39  ;;  %v2207_v35 = vld [vmem:[#allocation12_spill] sm:$0xff]  ;;  %v2208_v45 = vld [vmem:[#allocation10_spill] sm:$0xff] }
  0x78   : > { %v633_v6 = vadd.f32 %v617_v13, %v597_v55  ;;  %829 = vst.msk [vmem:[#allocation3 + $0x18] sm:$0xff] %vm251_vm0, %v813_v22  ;;  %v725_v19 = vmul.f32 %v1625_v15, %v2206_v30  ;;  %v384_v47 = vrot.slane %v1976_v5, 7  ;;  %v605_v54 = vadd.f32 %v589_v44, %v2207_v35  ;;  %v336_v22 = vld [vmem:[#allocation2 + $0x90] sm:$0xff] }
  0x79   : > { %v712_v8 = vadd.f32 %v696_v57, %v676_v33  ;;  %v852_v25 = vld [vmem:[#allocation3 + $0x50] sm:$0xff]  ;;  %v805_v38 = vadd.f32 %v1705_v3, %v783_v32  ;;  %v798_v18 = vadd.f32 %v1705_v3, %v776_v31  ;;  %v625_v0 = vmul.f32 %v1591_v60, %v1852_v4 }
  0x7a   : > { %v669_v48 = vadd.f32 %v1943_v11, %v633_v6  ;;  %1304 = vmatprep.mubr.msk.f32.mxu1 %vm251_vm0, %v852_v25  ;;  %v590_v24 = vmul.f32 %v1589_v59, %v417_v34  ;;  %v662_v21 = vmul.f32 %v1593_v61, %v446_v41  ;;  %v761_v44 = vmul.f32 %v1646_v46, %v2208_v45 }
  0x7b   : > { %v748_v28 = vadd.f32 %v732_v12, %v712_v8  ;;  %v821_v58 = vmax.f32 %v805_v38, 0.0  ;;  %v814_v53 = vmax.f32 %v798_v18, 0.0  ;;  %v385_v14 = vsel %vm358_vm2, %v383_v16, %v384_v47  ;;  %v2209_v8 = vld [vmem:[#allocation7_spill] sm:$0xff] }
  0x7c   : > { %v705_v57 = vadd.f32 %v689_v36, %v669_v48  ;;  %v2025_v11 = vsel %vm419_vm3, %v445_v40, 0.0  ;;  %v641_v55 = vadd.f32 %v625_v0, %v605_v54  ;;  %v697_v13 = vmul.f32 %v1611_v7, %v385_v14 }
  0x7d   : > { %v784_v42 = vadd.f32 %v768_v43, %v748_v28  ;;  %837 = vst.msk [vmem:[#allocation3 + $0x58] sm:$0xff] %vm251_vm0, %v821_v58  ;;  %830 = vst.msk [vmem:[#allocation3 + $0x20] sm:$0xff] %vm251_vm0, %v814_v53  ;;  %v733_v41 = vmul.f32 %v1625_v15, %v1976_v5  ;;  %v582_v33 = vmul.f32 %v1589_v59, %v1599_v63  ;;  %v2044_v63 = vld [vmem:[#allocation2 + $0x98] sm:$0xff]  ;;  %v386_v47 = vrot.slane %v336_v22, 7  ;;  %v2210_v28 = vld [vmem:[#allocation6_spill] sm:$0xff] }
  0x7e   : > { %v741_v34 = vadd.f32 %v725_v19, %v705_v57  ;;  %v618_v16 = vmul.f32 %v1591_v60, %v1547_v37  ;;  %v677_v12 = vadd.f32 %v661_v20, %v641_v55  ;;  %v769_v43 = vmul.f32 %v1646_v46, %v2025_v11 }
  0x7f   : > { %v806_v40 = vadd.f32 %v1705_v3, %v784_v42  ;;  %v654_v32 = vmul.f32 %v1593_v61, %v1657_v1  ;;  %v845_v31 = vld [vmem:[#allocation3 + $0x18] sm:$0xff]  ;;  %v598_v36 = vadd.f32 %v582_v33, %v1861_v27  ;;  %v690_v19 = vmul.f32 %v1611_v7, %v2209_v8 }
  0x80   : > { %v777_v6 = vadd.f32 %v761_v44, %v741_v34  ;;  %1293 = vmatmul.mubr.msk.f32.gmra.mrb[2].mxu0 %vm251_vm0, %v845_v31  ;;  %v713_v20 = vadd.f32 %v697_v13, %v677_v12  ;;  %v447_v54 = vrot.slane %v336_v22, 1  ;;  %v448_v25 = vrot.slane %v2044_v63, 1 }
  0x81   : > { %v822_v35 = vmax.f32 %v806_v40, 0.0  ;;  %v634_v1 = vadd.f32 %v618_v16, %v598_v36  ;;  %v418_v18 = vsel %vm358_vm2, 0.0, %v386_v47  ;;  %v606_v27 = vadd.f32 %v590_v24, %v1898_v9  ;;  %v2211_v16 = vld [vmem:[#allocation9_spill] sm:$0xff] }
  0x82   : > { %v799_v38 = vadd.f32 %v1705_v3, %v777_v6  ;;  %v591_v48 = vmul.f32 %v1589_v59, %v385_v14  ;;  %v749_v0 = vadd.f32 %v733_v41, %v713_v20  ;;  %v726_v44 = vmul.f32 %v1625_v15, %v2210_v28 }
  0x83   : > { %838 = vst.msk [vmem:[#allocation3 + $0x60] sm:$0xff] %vm251_vm0, %v822_v35  ;;  %v626_v58 = vmul.f32 %v1591_v60, %v1959_v56  ;;  %v670_v57 = vadd.f32 %v654_v32, %v634_v1  ;;  %v449_v42 = vsel %vm419_vm3, %v447_v54, %v448_v25  ;;  %v698_v55 = vmul.f32 %v1611_v7, %v418_v18 }
  0x84   : > { %v815_v53 = vmax.f32 %v799_v38, 0.0  ;;  %v853_v13 = vld [vmem:[#allocation3 + $0x58] sm:$0xff]  ;;  %v846_v34 = vld [vmem:[#allocation3 + $0x20] sm:$0xff]  ;;  %v785_v9 = vadd.f32 %v769_v43, %v749_v0  ;;  %v583_v14 = vmul.f32 %v1589_v59, %v1764_v39  ;;  %v619_v41 = vmul.f32 %v1591_v60, %v2206_v30 }
  0x85   : > { %v642_v24 = vadd.f32 %v626_v58, %v606_v27  ;;  %1305 = vmatmul.mubr.msk.f32.gmra.mrb[2].mxu1 %vm251_vm0, %v853_v13  ;;  %1295 = vmatprep.mubr.msk.f32.mxu0 %vm251_vm0, %v846_v34  ;;  %v706_v33 = vadd.f32 %v690_v19, %v670_v57  ;;  %v762_v40 = vmul.f32 %v1646_v46, %v2211_v16  ;;  %v387_v43 = vrot.slane %v2044_v63, 7  ;;  %v2212_v0 = vld [vmem:[#allocation11_spill] sm:$0xff] }
  0x86   : > { %831 = vst.msk [vmem:[#allocation3 + $0x28] sm:$0xff] %vm251_vm0, %v815_v53  ;;  %v734_v12 = vmul.f32 %v1625_v15, %v336_v22  ;;  %v807_v32 = vadd.f32 %v1705_v3, %v785_v9  ;;  %v599_v39 = vadd.f32 %v583_v14, %v1937_v10  ;;  %v655_v31 = vmul.f32 %v1593_v61, %v2208_v45 }
  0x87   : > { %v678_v59 = vadd.f32 %v662_v21, %v642_v24  ;;  %v742_v6 = vadd.f32 %v726_v44, %v706_v33  ;;  %v770_v36 = vmul.f32 %v1646_v46, %v449_v42  ;;  %v691_v8 = vmul.f32 %v1611_v7, %v1779_v52 }
  0x88   : > { %v388_v19 = vsel %vm358_vm2, %v386_v47, %v387_v43  ;;  %v823_v35 = vmax.f32 %v807_v32, 0.0  ;;  %v635_v20 = vadd.f32 %v619_v41, %v599_v39  ;;  %v607_v54 = vadd.f32 %v591_v48, %v1970_v2 }
  0x89   : > { %v714_v22 = vadd.f32 %v698_v55, %v678_v59  ;;  %v663_v10 = vmul.f32 %v1593_v61, %v2025_v11  ;;  %v778_v21 = vadd.f32 %v762_v40, %v742_v6  ;;  %v627_v45 = vmul.f32 %v1591_v60, %v1976_v5  ;;  %v2213_v6 = vld [vmem:[#allocation4_spill] sm:$0xff] }
  0x8a   : > { %v854_v38 = vld [vmem:[#allocation3 + $0x60] sm:$0xff]  ;;  %839 = vst.msk [vmem:[#allocation3 + $0x68] sm:$0xff] %vm251_vm0, %v823_v35  ;;  %v671_v1 = vadd.f32 %v655_v31, %v635_v20  ;;  %v727_v47 = vmul.f32 %v1625_v15, %v1629_v17  ;;  %v699_v27 = vmul.f32 %v1611_v7, %v388_v19  ;;  %v763_v60 = vmul.f32 %v1646_v46, %v2212_v0 }
  0x8b   : > { %1307 = vmatprep.mubr.msk.f32.mxu1 %vm251_vm0, %v854_v38  ;;  %v750_v52 = vadd.f32 %v734_v12, %v714_v22  ;;  %v800_v18 = vadd.f32 %v1705_v3, %v778_v21  ;;  %v643_v2 = vadd.f32 %v627_v45, %v607_v54  ;;  %v479_v44 = vsel %vm419_vm3, %v448_v25, 0.0 }
  0x8c   : > { %v707_v11 = vadd.f32 %v691_v8, %v671_v1  ;;  %v735_v57 = vmul.f32 %v1625_v15, %v2044_v63  ;;  %v771_v13 = vmul.f32 %v1646_v46, %v479_v44 }
  0x8d   : > { %v847_v48 = vld [vmem:[#allocation3 + $0x28] sm:$0xff]  ;;  %v786_v61 = vadd.f32 %v770_v36, %v750_v52  ;;  %v816_v58 = vmax.f32 %v800_v18, 0.0  ;;  %v679_v53 = vadd.f32 %v663_v10, %v643_v2 }
  0x8e   : > { %1296 = vmatmul.mubr.msk.f32.gmra.mrb[4].mxu0 %vm251_vm0, %v847_v48  ;;  %v743_v55 = vadd.f32 %v727_v47, %v707_v11  ;;  %v2214_v52 = vld [vmem:[#allocation5_spill] sm:$0xff] }
  0x8f   : > { %v808_v42 = vadd.f32 %v1705_v3, %v786_v61  ;;  %832 = vst.msk [vmem:[#allocation3 + $0x30] sm:$0xff] %vm251_vm0, %v816_v58  ;;  %v715_v7 = vadd.f32 %v699_v27, %v679_v53 }
  0x90   : > { %v779_v9 = vadd.f32 %v763_v60, %v743_v55 }
  0x91   : > { %v824_v34 = vmax.f32 %v808_v42, 0.0  ;;  %v855_v24 = vld [vmem:[#allocation3 + $0x68] sm:$0xff]  ;;  %v751_v14 = vadd.f32 %v735_v57, %v715_v7 }
  0x92   : > { %1308 = vmatmul.mubr.msk.f32.gmra.mrb[4].mxu1 %vm251_vm0, %v855_v24  ;;  %v801_v25 = vadd.f32 %v1705_v3, %v779_v9 }
  0x93   : > { %840 = vst.msk [vmem:[#allocation3 + $0x70] sm:$0xff] %vm251_vm0, %v824_v34  ;;  %v787_v41 = vadd.f32 %v771_v13, %v751_v14 }
  0x94   : > { %v817_v15 = vmax.f32 %v801_v25, 0.0 }
  0x95   : > { %v809_v63 = vadd.f32 %v1705_v3, %v787_v41  ;;  %v1264_v3 = vld [vmem:[%s2178_s4] ss:$0 sm:$0xff] }
  0x96   : > { %v848_v33 = vld [vmem:[#allocation3 + $0x30] sm:$0xff]  ;;  %833 = vst.msk [vmem:[#allocation3 + $0x38] sm:$0xff] %vm251_vm0, %v817_v15 }
  0x97   : > { %1298 = vmatprep.mubr.msk.f32.mxu0 %vm251_vm0, %v848_v33  ;;  %v825_v46 = vmax.f32 %v809_v63, 0.0 }
  0x99   : > { %841 = vst.msk [vmem:[#allocation3 + $0x78] sm:$0xff] %vm251_vm0, %v825_v46 }
  0x9a   : > { %v856_v16 = vld [vmem:[#allocation3 + $0x70] sm:$0xff] }
  0x9b   : > { %1310 = vmatprep.mubr.msk.f32.mxu1 %vm251_vm0, %v856_v16 }
  0x9d   : > { %v849_v40 = vld [vmem:[#allocation3 + $0x38] sm:$0xff] }
  0x9e   : > { %1299 = vmatmul.mubr.msk.f32.gmra.mrb[6].mxu0 %vm251_vm0, %v849_v40 }
  0xa0   : > { %v857_v12 = vld [vmem:[#allocation3 + $0x78] sm:$0xff] }
  0xa1   : > { %1311 = vmatmul.mubr.msk.f32.gmra.mrb[6].mxu1 %vm251_vm0, %v857_v12 }
 0x137   : > { %v1291_v43 = vpop.f32.mrb[0].mxu0 }
 0x138   : > { %v1064_v32 = vadd.f32 %v1291_v43, %v1264_v3  ;;  %v977_v59 = vpop.f32.mrb[1].mxu0 }
 0x139   : > { %v1063_v39 = vadd.f32 %v1264_v3, %v977_v59 }
 0x13a   : > { %v1096_v31 = vadd.f32 %v1064_v32, %v1533_v26 }
 0x13b   : > { %v1095_v36 = vadd.f32 %v1063_v39, %v2213_v6 }
 0x13c   : > { %1112 = vst.msk [vmem:[%s1483_s14 + $0x8] sm:$0xff] %vm251_vm0, %v1096_v31 }
 0x13d   : > { %1111 = vst.msk [vmem:[%s1483_s14] sm:$0xff] %vm251_vm0, %v1095_v36 }
 0x140   : > { %v1303_v8 = vpop.f32.mrb[0].mxu1 }
 0x141   : > { %v1072_v19 = vadd.f32 %v1303_v8, %v1264_v3  ;;  %v1017_v35 = vpop.f32.mrb[1].mxu1 }
 0x142   : > { %v1071_v22 = vadd.f32 %v1264_v3, %v1017_v35 }
 0x143   : > { %v1104_v20 = vadd.f32 %v1072_v19, %v1629_v17 }
 0x144   : > { %v1103_v54 = vadd.f32 %v1071_v22, %v2210_v28 }
 0x145   : > { %1120 = vst.msk [vmem:[%s1483_s14 + $0x48] sm:$0xff] %vm251_vm0, %v1104_v20 }
 0x146   : > { %1119 = vst.msk [vmem:[%s1483_s14 + $0x40] sm:$0xff] %vm251_vm0, %v1103_v54 }
 0x153   : > { %v1294_v26 = vpop.f32.mrb[2].mxu0 }
 0x154   : > { %v1066_v38 = vadd.f32 %v1294_v26, %v1264_v3  ;;  %v987_v10 = vpop.f32.mrb[3].mxu0 }
 0x155   : > { %v1065_v21 = vadd.f32 %v1264_v3, %v987_v10 }
 0x156   : > { %v1098_v45 = vadd.f32 %v1066_v38, %v1538_v29 }
 0x157   : > { %v1097_v1 = vadd.f32 %v1065_v21, %v2214_v52 }
 0x158   : > { %1114 = vst.msk [vmem:[%s1483_s14 + $0x18] sm:$0xff] %vm251_vm0, %v1098_v45  ;;  %v1306_v17 = vpop.f32.mrb[2].mxu1 }
 0x159   : > { %v1074_v47 = vadd.f32 %v1306_v17, %v1264_v3  ;;  %1113 = vst.msk [vmem:[%s1483_s14 + $0x10] sm:$0xff] %vm251_vm0, %v1097_v1  ;;  %v1027_v28 = vpop.f32.mrb[3].mxu1 }
 0x15a   : > { %v1073_v18 = vadd.f32 %v1264_v3, %v1027_v28 }
 0x15b   : > { %v1106_v2 = vadd.f32 %v1074_v47, %v1633_v23 }
 0x15c   : > { %v1105_v27 = vadd.f32 %v1073_v18, %v1568_v50 }
 0x15d   : > { %1122 = vst.msk [vmem:[%s1483_s14 + $0x58] sm:$0xff] %vm251_vm0, %v1106_v2 }
 0x15e   : > { %1121 = vst.msk [vmem:[%s1483_s14 + $0x50] sm:$0xff] %vm251_vm0, %v1105_v27 }
 0x161   : > { %v1297_v29 = vpop.f32.mrb[4].mxu0 }
 0x162   : > { %v1068_v48 = vadd.f32 %v1297_v29, %v1264_v3  ;;  %v997_v61 = vpop.f32.mrb[5].mxu0 }
 0x163   : > { %v1067_v11 = vadd.f32 %v1264_v3, %v997_v61 }
 0x164   : > { %v1100_v0 = vadd.f32 %v1068_v48, %v1815_v49 }
 0x165   : > { %v1099_v60 = vadd.f32 %v1067_v11, %v1806_v51  ;;  %v1309_v44 = vpop.f32.mrb[4].mxu1 }
 0x166   : > { %1116 = vst.msk [vmem:[%s1483_s14 + $0x28] sm:$0xff] %vm251_vm0, %v1100_v0  ;;  %v1076_v23 = vadd.f32 %v1309_v44, %v1264_v3  ;;  %v1037_v50 = vpop.f32.mrb[5].mxu1 }
 0x167   : > { %1115 = vst.msk [vmem:[%s1483_s14 + $0x20] sm:$0xff] %vm251_vm0, %v1099_v60  ;;  %v1075_v58 = vadd.f32 %v1264_v3, %v1037_v50 }
 0x168   : > { %v1108_v53 = vadd.f32 %v1076_v23, %v1852_v4 }
 0x169   : > { %v1107_v57 = vadd.f32 %v1075_v58, %v1846_v62 }
 0x16a   : > { %1124 = vst.msk [vmem:[%s1483_s14 + $0x68] sm:$0xff] %vm251_vm0, %v1108_v53 }
 0x16b   : > { %1123 = vst.msk [vmem:[%s1483_s14 + $0x60] sm:$0xff] %vm251_vm0, %v1107_v57 }
 0x171   : > { %v1300_v49 = vpop.f32.mrb[6].mxu0 }
 0x172   : > { %v1070_v51 = vadd.f32 %v1300_v49, %v1264_v3  ;;  %v1007_v42 = vpop.f32.mrb[7].mxu0 }
 0x173   : > { %v1069_v55 = vadd.f32 %v1264_v3, %v1007_v42 }
 0x174   : > { %v1102_v7 = vadd.f32 %v1070_v51, %v2206_v30  ;;  %v1312_v13 = vpop.f32.mrb[6].mxu1 }
 0x175   : > { %v1078_v34 = vadd.f32 %v1312_v13, %v1264_v3  ;;  %v1101_v9 = vadd.f32 %v1069_v55, %v1547_v37  ;;  %v1047_v4 = vpop.f32.mrb[7].mxu1 }
 0x176   : > { %1118 = vst.msk [vmem:[%s1483_s14 + $0x38] sm:$0xff] %vm251_vm0, %v1102_v7  ;;  %v1077_v62 = vadd.f32 %v1264_v3, %v1047_v4 }
 0x177   : > { %v1110_v24 = vadd.f32 %v1078_v34, %v1976_v5  ;;  %1117 = vst.msk [vmem:[%s1483_s14 + $0x30] sm:$0xff] %vm251_vm0, %v1101_v9 }
 0x178   : > { %v1109_v14 = vadd.f32 %v1077_v62, %v1959_v56 }
 0x179   : > { %1126 = vst.msk [vmem:[%s1483_s14 + $0x78] sm:$0xff] %vm251_vm0, %v1110_v24 }
 0x17a   : > { %1125 = vst.msk [vmem:[%s1483_s14 + $0x70] sm:$0xff] %vm251_vm0, %v1109_v14 }
 0x17b PF: > { %s15_s22 = sadd.s32 1, %s1394_s22   ;;  %s2215_s18 = smov %s1386_s20 }
 0x17c   : > { %p12_p9 = scmp.ge.s32.totalorder %s15_s22, 6   ;;  %s2216_s19 = smov %s1390_s21 }
 0x17d   : > { %s2217_s20 = smov %s2220_s23  ;;  %s2218_s21 = smov %s2224_s24 }
 0x17e   :  { %14 = sbr.rel (!%p12_p9) target bundleno = 3 (0x3), region = 83 }

</bundles_post_ra>
